<compile_context>
chip_gen: v5e
topology: v5e:2x2
jax: 0.10.0
libtpu: 0.0.40
codegen_flags: <defaults>
</compile_context>

<pallas_src>
import functools

import jax
import jax.numpy as jnp
from jax.experimental import pallas as pl
from jax.experimental.pallas import tpu as pltpu


def dice_loss_kernel(preds_ref, tgt_ref, out_ref, acc_tp, acc_p, acc_cnt, *, hw):
    """Grid: (N, cdiv(HW, tile)); axis 0 "parallel", axis 1 "arbitrary".

    Per step: channel softmax, one-hot mask from target ids, per-vreg lane
    reduction (XLU) into tiny (C, 1) resident accumulators. At the last j of
    each batch element, the per-batch partial sums (tp, sum_p, cnt) are
    written to the (C, 3) output block; alpha/beta/dice happen in a JAX
    epilogue.
    """
    j = pl.program_id(1)
    n_j = pl.num_programs(1)
    tile = preds_ref.shape[1]

    @pl.when(j == 0)
    def _():
        acc_tp[...] = jnp.zeros_like(acc_tp)
        acc_p[...] = jnp.zeros_like(acc_p)
        acc_cnt[...] = jnp.zeros_like(acc_cnt)

    logits = preds_ref[...].astype(jnp.float32)               # (C, tile)
    tgt = tgt_ref[...].astype(jnp.int32)                      # (1, tile)

    needs_mask = (hw % tile) != 0                             # static
    if needs_mask:
        col = jax.lax.broadcasted_iota(jnp.int32, (1, tile), 1) + j * tile
        valid = col < hw                                      # (1, tile)
        # Keep out-of-range garbage (possibly NaN/inf) out of the softmax.
        logits = jnp.where(valid, logits, 0.0)

    m = jnp.max(logits, axis=0, keepdims=True)                # (1, tile)
    e = jnp.exp(logits - m)
    denom = jnp.sum(e, axis=0, keepdims=True)                 # (1, tile)
    inv = pl.reciprocal(denom, approx=False)
    P = e * inv                                               # softmax over C

    cls_ids = jax.lax.broadcasted_iota(jnp.int32, logits.shape, 0)
    onehot = cls_ids == tgt                                   # (C, tile) one-hot
    if needs_mask:
        onehot = onehot & valid
        p_valid = P * valid.astype(jnp.float32)
    else:
        p_valid = P
    maskf = onehot.astype(jnp.float32)

    # Per-step cross-lane reductions (XLU) into tiny resident accumulators:
    # only three (C, 1)-sized adds/stores per step regardless of tile size.
    acc_tp[...] += jnp.sum(P * maskf, axis=1, keepdims=True)   # TP
    acc_p[...] += jnp.sum(p_valid, axis=1, keepdims=True)      # TP + FP
    acc_cnt[...] += jnp.sum(maskf, axis=1, keepdims=True)      # TP + FN

    @pl.when(j == n_j - 1)
    def _():
        # Three 1-lane masked stores, once per batch element — negligible.
        out_ref[:, 0:1] = acc_tp[...]
        out_ref[:, 1:2] = acc_p[...]
        out_ref[:, 2:3] = acc_cnt[...]


def _pick_tile(hw, c, itemsize, target_block_bytes=2 << 20, max_tile=32768):
    """Lane tile sized so one preds block is ~target_block_bytes (>= ~1 MB).

    Tile is a multiple of 128 (or the full row when HW is small); the grid
    uses cdiv + in-kernel masking, so HW need not be divisible by the tile.
    """
    lanes = target_block_bytes // (max(c, 8) * itemsize)      # sublane padding
    lanes = min(lanes, max_tile)
    lanes = max((lanes // 128) * 128, 128)
    if hw <= lanes:
        return hw
    return lanes


def dice_loss(preds, targets, target_block_bytes=2 << 20, max_tile=32768):
    """preds: (N, C, H, W) float logits; targets: (N, 1, H, W) int class ids."""
    N, C, H, W = preds.shape
    HW = H * W
    tile = _pick_tile(HW, C, jnp.dtype(preds.dtype).itemsize,
                      target_block_bytes, max_tile)
    n_j = pl.cdiv(HW, tile)

    # Free reshapes only — no wrapper-side casts or transposes.
    preds3 = preds.reshape(N, C, HW)
    tgt3 = targets.reshape(N, 1, HW)

    partials = pl.pallas_call(
        functools.partial(dice_loss_kernel, hw=HW),
        out_shape=jax.ShapeDtypeStruct((N, C, 3), jnp.float32),
        grid_spec=pltpu.PrefetchScalarGridSpec(
            num_scalar_prefetch=0,
            grid=(N, n_j),
            in_specs=[
                # Leading batch dim squeezed; kernel sees (C, tile) / (1, tile).
                pl.BlockSpec((None, C, tile), lambda n, j: (n, 0, j)),
                pl.BlockSpec((None, 1, tile), lambda n, j: (n, 0, j)),
            ],
            out_specs=pl.BlockSpec((None, C, 3), lambda n, j: (n, 0, 0)),
            scratch_shapes=[
                pltpu.VMEM((C, 1), jnp.float32),   # sum(P * mask)  -> TP
                pltpu.VMEM((C, 1), jnp.float32),   # sum(P)         -> TP + FP
                pltpu.VMEM((C, 1), jnp.float32),   # sum(mask)      -> TP + FN
            ],
        ),
        compiler_params=pltpu.CompilerParams(
            dimension_semantics=("parallel", "arbitrary"),
        ),
    )(preds3, tgt3)

    # Tiny finalize epilogue on the (N, C, 3) per-batch partial sums.
    sums = jnp.sum(partials, axis=0)                          # (C, 3)
    tp = sums[:, 0]
    sum_p = sums[:, 1]
    cnt = sums[:, 2]
    smooth = jnp.float32(1e-5)
    fp = sum_p - tp                                           # sum(P*(1-mask))
    fn = cnt - tp                                             # sum((1-P)*mask)
    alpha = jnp.clip(fp / (fp + fn + smooth), 0.2, 0.8)       # adaptive alpha
    beta = 1.0 - alpha
    den = tp + alpha * fp + beta * fn
    dice = tp / (den + smooth)
    return jnp.sum(1.0 - dice) / jnp.float32(C)               # reduce + size_average


def dice_loss_ref(preds, targets):
    """Pure-JAX reference mirroring the PyTorch forward (for verification)."""
    N, C, H, W = preds.shape
    P = jax.nn.softmax(preds.astype(jnp.float32), axis=1)
    class_mask = jax.nn.one_hot(targets[:, 0], C, axis=1, dtype=jnp.float32)
    smooth = jnp.float32(1e-5)
    TP = P * class_mask
    FP = P * (1.0 - class_mask)
    FN = (1.0 - P) * class_mask
    tp = jnp.sum(TP, axis=(0, 2, 3))
    fp = jnp.sum(FP, axis=(0, 2, 3))
    fn = jnp.sum(FN, axis=(0, 2, 3))
    alpha = jnp.clip(fp / (fp + fn + smooth), 0.2, 0.8)
    beta = 1.0 - alpha
    num = tp
    den = num + alpha * fp + beta * fn
    dice = num / (den + smooth)
    return jnp.sum(1.0 - dice) / jnp.float32(C)


if __name__ == "__main__":
    key = jax.random.PRNGKey(0)
    k1, k2 = jax.random.split(key)
    N, C, H, W = 2, 4, 16, 16
    preds = jax.random.normal(k1, (N, C, H, W), dtype=jnp.float32)
    targets = jax.random.randint(k2, (N, 1, H, W), 0, C, dtype=jnp.int32)

    loss = dice_loss(preds, targets)
    jax.block_until_ready(loss)

    ref = dice_loss_ref(preds, targets)
    assert jnp.allclose(loss, ref, atol=1e-5, rtol=1e-5), (float(loss), float(ref))
    print("KERNEL_OK")
</pallas_src>

<mosaic_0001>
module attributes {stable_mosaic.version = 11 : i64} {
  func.func @dice_loss_kernel(%arg0: i32, %arg1: i32, %arg2: memref<1x4x256xf32, #tpu.memory_space<vmem>>, %arg3: memref<1x1x256xi32, #tpu.memory_space<vmem>>, %arg4: memref<1x4x3xf32, #tpu.memory_space<vmem>>, %arg5: memref<4x1xf32, #tpu.memory_space<vmem>>, %arg6: memref<4x1xf32, #tpu.memory_space<vmem>>, %arg7: memref<4x1xf32, #tpu.memory_space<vmem>>) attributes {dimension_semantics = [#tpu.dimension_semantics<parallel>, #tpu.dimension_semantics<arbitrary>], iteration_bounds = array<i64: 2, 1>, scalar_prefetch = 0 : i64, scratch_operands = 3 : i64, tpu.core_type = #tpu.core_type<tc>, window_params = [{transform_indices = @transform_0, window_bounds = array<i64: 1, 4, 256>}, {transform_indices = @transform_1, window_bounds = array<i64: 1, 1, 256>}, {transform_indices = @transform_2, window_bounds = array<i64: 1, 4, 3>}]} {
    %c0_i32 = arith.constant 0 : i32
    %0 = arith.cmpi eq, %arg1, %c0_i32 : i32
    %1 = arith.extui %0 : i1 to i32
    %c0_i32_0 = arith.constant 0 : i32
    %2 = arith.cmpi ne, %1, %c0_i32_0 : i32
    scf.if %2 {
      %cst_24 = arith.constant 0.000000e+00 : f32
      %41 = vector.broadcast %cst_24 : f32 to vector<4x1xf32>
      %c0_25 = arith.constant 0 : index
      %c0_26 = arith.constant 0 : index
      %42 = vector.load %arg5[%c0_25, %c0_26] : memref<4x1xf32, #tpu.memory_space<vmem>>, vector<4x1xf32>
      tpu.vector_store %arg5[%c0_25, %c0_26], %41 {strides = array<i32>} : memref<4x1xf32, #tpu.memory_space<vmem>>, vector<4x1xf32>,
      %cst_27 = arith.constant 0.000000e+00 : f32
      %43 = vector.broadcast %cst_27 : f32 to vector<4x1xf32>
      %c0_28 = arith.constant 0 : index
      %c0_29 = arith.constant 0 : index
      %44 = vector.load %arg6[%c0_28, %c0_29] : memref<4x1xf32, #tpu.memory_space<vmem>>, vector<4x1xf32>
      tpu.vector_store %arg6[%c0_28, %c0_29], %43 {strides = array<i32>} : memref<4x1xf32, #tpu.memory_space<vmem>>, vector<4x1xf32>,
      %cst_30 = arith.constant 0.000000e+00 : f32
      %45 = vector.broadcast %cst_30 : f32 to vector<4x1xf32>
      %c0_31 = arith.constant 0 : index
      %c0_32 = arith.constant 0 : index
      %46 = vector.load %arg7[%c0_31, %c0_32] : memref<4x1xf32, #tpu.memory_space<vmem>>, vector<4x1xf32>
      tpu.vector_store %arg7[%c0_31, %c0_32], %45 {strides = array<i32>} : memref<4x1xf32, #tpu.memory_space<vmem>>, vector<4x1xf32>,
    } else {
    }
    %c0 = arith.constant 0 : index
    %c0_1 = arith.constant 0 : index
    %c0_2 = arith.constant 0 : index
    %3 = vector.load %arg2[%c0, %c0_1, %c0_2] : memref<1x4x256xf32, #tpu.memory_space<vmem>>, vector<1x4x256xf32>
    %4 = vector.shape_cast %3 : vector<1x4x256xf32> to vector<4x256xf32>
    %c0_3 = arith.constant 0 : index
    %c0_4 = arith.constant 0 : index
    %c0_5 = arith.constant 0 : index
    %5 = vector.load %arg3[%c0_3, %c0_4, %c0_5] : memref<1x1x256xi32, #tpu.memory_space<vmem>>, vector<1x1x256xi32>
    %6 = vector.shape_cast %5 : vector<1x1x256xi32> to vector<1x256xi32>
    %cst = arith.constant dense<0xFF800000> : vector<256xf32>
    %7 = vector.multi_reduction <maximumf>, %4, %cst [0] : vector<4x256xf32> to vector<256xf32>
    %8 = vector.shape_cast %7 : vector<256xf32> to vector<1x256xf32>
    %9 = vector.broadcast %8 : vector<1x256xf32> to vector<4x256xf32>
    %10 = arith.subf %4, %9 : vector<4x256xf32>
    %11 = math.exp %10 : vector<4x256xf32>
    %cst_6 = arith.constant dense<0.000000e+00> : vector<256xf32>
    %12 = vector.multi_reduction <add>, %11, %cst_6 [0] : vector<4x256xf32> to vector<256xf32>
    %13 = vector.shape_cast %12 : vector<256xf32> to vector<1x256xf32>
    %14 = tpu.reciprocal %13 : vector<1x256xf32> -> vector<1x256xf32>
    %15 = vector.broadcast %14 : vector<1x256xf32> to vector<4x256xf32>
    %16 = arith.mulf %11, %15 : vector<4x256xf32>
    %17 = tpu.iota {dimensions = array<i32: 0>} : vector<4x256xi32>
    %18 = vector.broadcast %6 : vector<1x256xi32> to vector<4x256xi32>
    %19 = arith.cmpi eq, %17, %18 : vector<4x256xi32>
    %20 = arith.extui %19 : vector<4x256xi1> to vector<4x256xi32>
    %21 = arith.sitofp %20 : vector<4x256xi32> to vector<4x256xf32>
    %c0_7 = arith.constant 0 : index
    %c0_8 = arith.constant 0 : index
    %22 = vector.load %arg5[%c0_7, %c0_8] : memref<4x1xf32, #tpu.memory_space<vmem>>, vector<4x1xf32>
    %23 = arith.mulf %16, %21 : vector<4x256xf32>
    %cst_9 = arith.constant dense<0.000000e+00> : vector<4xf32>
    %24 = vector.multi_reduction <add>, %23, %cst_9 [1] : vector<4x256xf32> to vector<4xf32>
    %25 = vector.shape_cast %24 : vector<4xf32> to vector<4x1xf32>
    %26 = arith.addf %22, %25 : vector<4x1xf32>
    %c0_10 = arith.constant 0 : index
    %c0_11 = arith.constant 0 : index
    %27 = vector.load %arg5[%c0_10, %c0_11] : memref<4x1xf32, #tpu.memory_space<vmem>>, vector<4x1xf32>
    tpu.vector_store %arg5[%c0_10, %c0_11], %26 {strides = array<i32>} : memref<4x1xf32, #tpu.memory_space<vmem>>, vector<4x1xf32>,
    %c0_12 = arith.constant 0 : index
    %c0_13 = arith.constant 0 : index
    %28 = vector.load %arg6[%c0_12, %c0_13] : memref<4x1xf32, #tpu.memory_space<vmem>>, vector<4x1xf32>
    %cst_14 = arith.constant dense<0.000000e+00> : vector<4xf32>
    %29 = vector.multi_reduction <add>, %16, %cst_14 [1] : vector<4x256xf32> to vector<4xf32>
    %30 = vector.shape_cast %29 : vector<4xf32> to vector<4x1xf32>
    %31 = arith.addf %28, %30 : vector<4x1xf32>
    %c0_15 = arith.constant 0 : index
    %c0_16 = arith.constant 0 : index
    %32 = vector.load %arg6[%c0_15, %c0_16] : memref<4x1xf32, #tpu.memory_space<vmem>>, vector<4x1xf32>
    tpu.vector_store %arg6[%c0_15, %c0_16], %31 {strides = array<i32>} : memref<4x1xf32, #tpu.memory_space<vmem>>, vector<4x1xf32>,
    %c0_17 = arith.constant 0 : index
    %c0_18 = arith.constant 0 : index
    %33 = vector.load %arg7[%c0_17, %c0_18] : memref<4x1xf32, #tpu.memory_space<vmem>>, vector<4x1xf32>
    %cst_19 = arith.constant dense<0.000000e+00> : vector<4xf32>
    %34 = vector.multi_reduction <add>, %21, %cst_19 [1] : vector<4x256xf32> to vector<4xf32>
    %35 = vector.shape_cast %34 : vector<4xf32> to vector<4x1xf32>
    %36 = arith.addf %33, %35 : vector<4x1xf32>
    %c0_20 = arith.constant 0 : index
    %c0_21 = arith.constant 0 : index
    %37 = vector.load %arg7[%c0_20, %c0_21] : memref<4x1xf32, #tpu.memory_space<vmem>>, vector<4x1xf32>
    tpu.vector_store %arg7[%c0_20, %c0_21], %36 {strides = array<i32>} : memref<4x1xf32, #tpu.memory_space<vmem>>, vector<4x1xf32>,
    %c0_i32_22 = arith.constant 0 : i32
    %38 = arith.cmpi eq, %arg1, %c0_i32_22 : i32
    %39 = arith.extui %38 : i1 to i32
    %c0_i32_23 = arith.constant 0 : i32
    %40 = arith.cmpi ne, %39, %c0_i32_23 : i32
    scf.if %40 {
      %c0_24 = arith.constant 0 : index
      %c0_25 = arith.constant 0 : index
      %41 = vector.load %arg5[%c0_24, %c0_25] : memref<4x1xf32, #tpu.memory_space<vmem>>, vector<4x1xf32>
      %c0_26 = arith.constant 0 : index
      %c0_27 = arith.constant 0 : index
      %c0_28 = arith.constant 0 : index
      %42 = vector.load %arg4[%c0_26, %c0_27, %c0_28] : memref<1x4x3xf32, #tpu.memory_space<vmem>>, vector<1x4x1xf32>
      %43 = vector.shape_cast %42 : vector<1x4x1xf32> to vector<4x1xf32>
      %44 = vector.shape_cast %41 : vector<4x1xf32> to vector<1x4x1xf32>
      tpu.vector_store %arg4[%c0_26, %c0_27, %c0_28], %44 {strides = array<i32>} : memref<1x4x3xf32, #tpu.memory_space<vmem>>, vector<1x4x1xf32>,
      %c0_29 = arith.constant 0 : index
      %c0_30 = arith.constant 0 : index
      %45 = vector.load %arg6[%c0_29, %c0_30] : memref<4x1xf32, #tpu.memory_space<vmem>>, vector<4x1xf32>
      %c0_31 = arith.constant 0 : index
      %c0_32 = arith.constant 0 : index
      %c1 = arith.constant 1 : index
      %46 = vector.load %arg4[%c0_31, %c0_32, %c1] : memref<1x4x3xf32, #tpu.memory_space<vmem>>, vector<1x4x1xf32>
      %47 = vector.shape_cast %46 : vector<1x4x1xf32> to vector<4x1xf32>
      %48 = vector.shape_cast %45 : vector<4x1xf32> to vector<1x4x1xf32>
      tpu.vector_store %arg4[%c0_31, %c0_32, %c1], %48 {strides = array<i32>} : memref<1x4x3xf32, #tpu.memory_space<vmem>>, vector<1x4x1xf32>,
      %c0_33 = arith.constant 0 : index
      %c0_34 = arith.constant 0 : index
      %49 = vector.load %arg7[%c0_33, %c0_34] : memref<4x1xf32, #tpu.memory_space<vmem>>, vector<4x1xf32>
      %c0_35 = arith.constant 0 : index
      %c0_36 = arith.constant 0 : index
      %c2 = arith.constant 2 : index
      %50 = vector.load %arg4[%c0_35, %c0_36, %c2] : memref<1x4x3xf32, #tpu.memory_space<vmem>>, vector<1x4x1xf32>
      %51 = vector.shape_cast %50 : vector<1x4x1xf32> to vector<4x1xf32>
      %52 = vector.shape_cast %49 : vector<4x1xf32> to vector<1x4x1xf32>
      tpu.vector_store %arg4[%c0_35, %c0_36, %c2], %52 {strides = array<i32>} : memref<1x4x3xf32, #tpu.memory_space<vmem>>, vector<1x4x1xf32>,
    } else {
    }
    return
  }
  func.func @transform_0(%arg0: i32, %arg1: i32) -> (i32, i32, i32) {
    %c0_i32 = arith.constant 0 : i32
    %c0_i32_0 = arith.constant 0 : i32
    return %arg0, %c0_i32, %arg1 : i32, i32, i32
  }
  func.func @transform_1(%arg0: i32, %arg1: i32) -> (i32, i32, i32) {
    %c0_i32 = arith.constant 0 : i32
    %c0_i32_0 = arith.constant 0 : i32
    return %arg0, %c0_i32, %arg1 : i32, i32, i32
  }
  func.func @transform_2(%arg0: i32, %arg1: i32) -> (i32, i32, i32) {
    %c0_i32 = arith.constant 0 : i32
    %c0_i32_0 = arith.constant 0 : i32
    %c0_i32_1 = arith.constant 0 : i32
    return %arg0, %c0_i32, %c0_i32_0 : i32, i32, i32
  }
}

</mosaic_0001>

<bundles_post_ra>
// kernel: tpu_custom_call.1
= control target key start
LH: loop header
LB: loop body
LE: loop exit
PB: predicated region body
PF: predicated region fallthrough
CT: control target
= control target key end

     0   :  { %7 = vsyncpa [#allocation6], 0  ;;  %s853_s0 = inlined_call_operand.hbm [shape: f32[2,4,256], index: 0, kind: input, shape index: {}]   ;;  %s854_s1 = inlined_call_operand.hbm [shape: s32[2,1,256], index: 1, kind: input, shape index: {}]   ;;  %s855_s2 = inlined_call_operand.vmem [shape: f32[2,4,3], index: 2, kind: output, shape index: {}]  }
   0x1   :  { %9 = vsyncpa [#allocation6 + $0x1], 0 }
   0x2   :  { %10 = vsyncpa [#allocation8], 0 }
   0x3   :  { %12 = vsyncpa [#allocation8 + $0x1], 0  ;;  %s710_s9 = smov 0   ;;  %s712_s10 = smov 0  }
   0x4   :  { %s714_s11 = smov 0   ;;  %s716_s12 = smov 0  }
   0x5   :  { %s718_s13 = smov 0   ;;  %s720_s14 = smov 0  }
   0x6 LB: > { %s489_s15 = sadd.s32 4294967295, %s690_s14   ;;  %s30_s16 = sadd.s32 1, %s686_s13  ;;  %s690_s14 = sphi %s720_s14, %s18_s14   ;;  %s686_s13 = sphi %s718_s13, %s867_s13   ;;  %s682_s12 = sphi %s716_s12, %s866_s12   ;;  %s678_s11 = sphi %s714_s11, %s865_s11   ;;  %s674_s10 = sphi %s712_s10, %s864_s10   ;;  %s670_s9 = sphi %s710_s9, %s863_s9  }
   0x7   : > { %p32_p0 = scmp.ge.s32.totalorder %s30_s16, 2  ;;  %s39_s17 = sadd.s32 1, %s678_s11 }
   0x8   : > { %p46_p1 = scmp.ne.s32.totalorder %s678_s11, %s674_s10  ;;  %p47_p2 = scmp.eq.s32.totalorder %s690_s14, 0 }
   0x9   : > { %s869_s16 = smov (%p32_p0, %s30_s16), 0  ;;  %p52_p4 = scmp.ne.s32.totalorder %s674_s10, %s670_s9 }
   0xa   : > { %p746_p3 = por %p47_p2, %p46_p1  ;;  %s34_s19 = ssub.s32 %s686_s13, %s869_s16 }
   0xb   : > { %p53_p5 = scmp.eq.s32.totalorder %s489_s15, 0  ;;  %p37_p6 = scmp.eq.s32.totalorder %s34_s19, 0 }
   0xc   : > { %p518_p8 = scmp.lt.s32.totalorder %s690_s14, 2  ;;  %s130_s22 = sand.u32 1, %s678_s11  }
   0xd   : > { %p753_p7 = por %p53_p5, %p52_p4  ;;  %s506_s23 = sshll.u32 %s686_s13, 3 }
   0xe   : > { %s759_s21 = scalar_select %p37_p6, %s678_s11, %s39_s17  }
   0xf   : > { %s493_s24 = sshll.u32 %s130_s22, 3  ;;  %s141_s27 = scalar_lea.hbm %s853_s0, %s506_s23 }
  0x10   : > { %s143_s28 = sshll.u32 %s141_s27, 4  ;;  %s134_s29 = scalar_lea.vmem [#allocation5], %s493_s24  ;;  %s144_s28 = int_to_ptr.hbm [resolvable:$true] %s143_s28 }
  0x11   : > { %s145_s30 = sshll.u32 %s134_s29, 4  ;;  %p768_p9 = pnand %p518_p8, %p746_p3  ;;  %s146_s30 = int_to_ptr.vmem [resolvable:$true] %s145_s30 }
  0x12   : > { %p498_p10 = scmp.ge.s32.totalorder %s690_s14, 1  ;;  %p171_p11 = scmp.lt.s32.totalorder %s690_s14, 3 }
  0x13   : > { %s496_s4 = sshll.u32 %s130_s22, 1  ;;  %s131_s5 = scalar_lea.sflag [#allocation6], %s130_s22 }
  0x14   : > { %514 = dma.hbm_to_vmem [thread:$0]  (!%p768_p9), %s144_s28, 128, %s146_s30, %s131_s5  }
  0x15   : > { %p172_p12 = pnand %p498_p10, %p171_p11  ;;  %s497_s6 = sshll.u32 %s686_s13, 1 }
  0x16   : > { %s156_s7 = scalar_lea.vmem [#allocation7], %s496_s4  ;;  %s162_s17 = scalar_lea.hbm %s854_s1, %s497_s6 }
  0x17   : > { %s166_s8 = sshll.u32 %s156_s7, 4  ;;  %s164_s18 = sshll.u32 %s162_s17, 4  ;;  %s167_s8 = int_to_ptr.vmem [resolvable:$true] %s166_s8  ;;  %s165_s18 = int_to_ptr.hbm [resolvable:$true] %s164_s18 }
  0x18   : > { %s153_s19 = scalar_lea.sflag [#allocation8], %s130_s22  ;;  %175 = sbr.rel (%p172_p12) target bundleno = 377 (0x179), region = 28 }
  0x19   : > { %517 = dma.hbm_to_vmem [thread:$0]  (!%p768_p9), %s165_s18, 32, %s167_s8, %s153_s19  }
  0x1a   : > { %s177_s23 = sand.u32 (!%p172_p12), 1, %s674_s10  }
  0x1b   : > { %s499_s24 = sshll.u32 (!%p172_p12), %s177_s23, 3  ;;  %s178_s25 = scalar_lea.sflag (!%p172_p12), [#allocation6], %s177_s23 }
  0x1c   : > { %s181_s26 = scalar_lea.vmem (!%p172_p12), [#allocation5], %s499_s24 }
  0x1d   : > { %661 = dma.done.wait (%p753_p7), %s178_s25, 128  }
  0x1e   : > { %663 = vsyncadd (%p753_p7), %s178_s25, 4294967168  ;;  %s500_s27 = sshll.u32 %s177_s23, 1  ;;  %s188_s28 = scalar_lea.sflag [#allocation8], %s177_s23 }
  0x1f   : > { %s787_s29 = scalar_lea.vmem [#allocation7], %s500_s27 }
  0x20   : > { %665 = dma.done.wait (%p753_p7), %s188_s28, 32  }
  0x21   : > { %667 = vsyncadd (%p753_p7), %s188_s28, 4294967264  ;;  %v231_v0 = vld [vmem:[%s181_s26] sm:$0xff]  ;;  %vm239_vm0 = vcmask 1043456   ;;  %v316_v38 = vlaneseq  ;;  %v232_v39 = vld [vmem:[%s787_s29] sm:$0x3]  ;;  %v692_v60 = vmov 0.0  }
  0x22   : > { %234 = vst [vmem:[#allocation1] ss:$2 sm:$0xff] %v231_v0  ;;  %v319_v41 = vperm.slane %v232_v39, 1  ;;  %v318_v48 = vperm.slane %v232_v39, 0  ;;  %vm227_vm11 = vcmask 3072   ;;  %s693_s20 = smov 1  }
  0x23   : > { %v317_v40 = vshrl.u32 %v316_v38, 7  ;;  %229 = vst.msk [vmem:[#allocation3] sm:$0xf] %vm227_vm11, %v692_v60  ;;  %s694_s22 = smov 2   ;;  %p219_p13 = scmp.lt.s32.totalorder %s682_s12, 1  ;;  %vm379_vm12 = vcmask 11272  }
  0x24   : > { %228 = vst.msk [vmem:[#allocation2] sm:$0xf] %vm227_vm11, %v692_v60  ;;  %vm386_vm13 = vcmask 19472  }
  0x25   : > { %vm802_vm1 = vcmp.eq.s32.totalorder %v317_v40, %v319_v41  ;;  %vm320_vm10 = vcmp.eq.s32.totalorder %v317_v40, %v318_v48  ;;  %230 = vst.msk [vmem:[#allocation4] sm:$0xf] %vm227_vm11, %v692_v60  ;;  %s871_s12 = smov (!%p219_p13, %s682_s12), 1 }
  0x26   : > { %v503_v61 = vsel %vm802_vm1, 1.0, %v692_v60  ;;  %s501_s30 = sshll.u32 %s871_s12, 2 }
  0x27   : > { %s222_s5 = scalar_lea.vmem %s855_s2, %s501_s30 }
  0x29   : > { %v235_v1 = vld.sshfl [vmem:[#allocation1] sm:$0xff pattern:$0x75316420]  ;;  %v236_v2 = vld.sshfl [vmem:[#allocation1 + $0x8] sm:$0xff pattern:$0x75316420] }
  0x2a   : > { %v240_v3 = vsel %vm239_vm0, %v235_v1, -inf  ;;  %v247_v4 = vsel %vm239_vm0, %v236_v2, -inf  ;;  %v329_v1 = vrot.slane %v503_v61, 4 }
  0x2b   : > { %v241_v5 = vrot.slane %v240_v3, 4  ;;  %v248_v6 = vrot.slane %v247_v4, 4 }
  0x2d   : > { %v242_v7 = vmax.f32 %v240_v3, %v241_v5  ;;  %v249_v8 = vmax.f32 %v247_v4, %v248_v6  ;;  %v502_v4 = vsel %vm320_vm10, 1.0, %v692_v60 }
  0x2f   : > { %v243_v9 = vrot.slane %v242_v7, 2  ;;  %v250_v10 = vrot.slane %v249_v8, 2 }
  0x31   : > { %v244_v11 = vmax.f32 %v242_v7, %v243_v9  ;;  %v251_v12 = vmax.f32 %v249_v8, %v250_v10  ;;  %v330_v7 = vsel %vm239_vm0, %v502_v4, %v329_v1 }
  0x33   : > { %v245_v13 = vrot.slane %v244_v11, 1  ;;  %v252_v14 = vrot.slane %v251_v12, 1 }
  0x35   : > { %v246_v15 = vmax.f32 %v244_v11, %v245_v13  ;;  %v253_v16 = vmax.f32 %v251_v12, %v252_v14 }
  0x37   : > { %v256_v17 = vrot.slane %v253_v16, 4 }
  0x39   : > { %v257_v18 = vsel %vm239_vm0, %v246_v15, %v256_v17 }
  0x3a   : > { %v259_v19 = vsub.f32 %v231_v0, %v257_v18 }
  0x3c   : > { %v260_v20 = vmul.f32 1.442695, %v259_v19 }
  0x3e   : > { %570 = vpow2.f32 %v260_v20  ;;  %v362_v20 = vsel %vm239_vm0, %v502_v4, 0.0 }
  0x44   : > { %v796_v21 = vpop.eup %570 }
  0x45   : > { %263 = vst [vmem:[#allocation1] ss:$2 sm:$0xff] %v796_v21 }
  0x4c   : > { %v264_v22 = vld.sshfl [vmem:[#allocation1] sm:$0xff pattern:$0x75316420]  ;;  %v265_v23 = vld.sshfl [vmem:[#allocation1 + $0x8] sm:$0xff pattern:$0x75316420] }
  0x4d   : > { %v268_v24 = vsel %vm239_vm0, %v264_v22, 0.0  ;;  %v275_v25 = vsel %vm239_vm0, %v265_v23, 0.0  ;;  %v326_v23 = vld [vmem:[#allocation2] sm:$0xf] }
  0x4e   : > { %v269_v26 = vrot.slane %v268_v24, 4  ;;  %v276_v27 = vrot.slane %v275_v25, 4 }
  0x50   : > { %v270_v28 = vadd.f32 %v269_v26, %v268_v24  ;;  %v277_v29 = vadd.f32 %v276_v27, %v275_v25  ;;  %v347_v26 = vld [vmem:[#allocation3] sm:$0xf] }
  0x52   : > { %v271_v30 = vrot.slane %v270_v28, 2  ;;  %v278_v31 = vrot.slane %v277_v29, 2 }
  0x54   : > { %v272_v32 = vadd.f32 %v271_v30, %v270_v28  ;;  %v279_v33 = vadd.f32 %v278_v31, %v277_v29  ;;  %v361_v29 = vld [vmem:[#allocation4] sm:$0xf] }
  0x56   : > { %v273_v34 = vrot.slane %v272_v32, 1  ;;  %v280_v35 = vrot.slane %v279_v33, 1 }
  0x58   : > { %v274_v36 = vadd.f32 %v273_v34, %v272_v32  ;;  %v281_v37 = vadd.f32 %v280_v35, %v279_v33 }
  0x5a   : > { %572 = vrcp.f32 %v274_v36  ;;  %vm287_vm2 = vweird.f32 %v274_v36  ;;  %v291_v46 = vand.u32 2147483647, %v274_v36  ;;  %v293_v50 = vand.u32 2147483648, %v274_v36 }
  0x5b   : > { %574 = vrcp.f32 %v281_v37  ;;  %v307_v51 = vand.u32 2147483648, %v281_v37  ;;  %vm301_vm4 = vweird.f32 %v281_v37  ;;  %v305_v53 = vand.u32 2147483647, %v281_v37 }
  0x5c   : > { %v294_v58 = vor.u32 1.1754944e-38, %v293_v50  ;;  %vm292_vm8 = vcmp.eq.f32.partialorder %v291_v46, 8.507059e+37 }
  0x5d   : > { %v308_v59 = vor.u32 1.1754944e-38, %v307_v51  ;;  %vm306_vm9 = vcmp.eq.f32.partialorder %v305_v53, 8.507059e+37 }
  0x60   : > { %v573_v42 = vpop.eup %572 }
  0x61   : > { %v575_v43 = vpop.eup %574  ;;  %v283_v44 = vmul.f32 %v573_v42, %v274_v36  ;;  %vm288_vm3 = vweird.f32 %v573_v42 }
  0x62   : > { %v297_v47 = vmul.f32 %v575_v43, %v281_v37  ;;  %vm302_vm5 = vweird.f32 %v575_v43  ;;  %vm806_vm6 = vmor %vm287_vm2, %vm288_vm3 }
  0x63   : > { %v284_v49 = vsub.f32 1.0, %v283_v44  ;;  %vm303_vm7 = vmor %vm301_vm4, %vm302_vm5 }
  0x64   : > { %v298_v52 = vsub.f32 1.0, %v297_v47 }
  0x65   : > { %v285_v54 = vmul.f32 %v573_v42, %v284_v49 }
  0x66   : > { %v299_v56 = vmul.f32 %v575_v43, %v298_v52 }
  0x67   : > { %v286_v57 = vadd.f32 %v573_v42, %v285_v54 }
  0x68   : > { %v300_v62 = vadd.f32 %v575_v43, %v299_v56 }
  0x69   : > { %v290_v63 = vsel %vm806_vm6, %v573_v42, %v286_v57 }
  0x6a   : > { %v304_v0 = vsel %vm303_vm7, %v575_v43, %v300_v62  ;;  %v295_v2 = vsel %vm292_vm8, %v294_v58, %v290_v63 }
  0x6b   : > { %v309_v3 = vsel %vm306_vm9, %v308_v59, %v304_v0 }
  0x6c   : > { %v312_v5 = vrot.slane %v309_v3, 4 }
  0x6e   : > { %v313_v6 = vsel %vm239_vm0, %v295_v2, %v312_v5 }
  0x6f   : > { %v315_v8 = vmul.f32 %v796_v21, %v313_v6  ;;  %v363_v21 = vsel %vm239_vm0, %v503_v61, 0.0 }
  0x70   : > { %v364_v22 = vadd.f32 %v363_v21, %v362_v20 }
  0x71   : > { %v332_v9 = vmul.f32 %v330_v7, %v315_v8 }
  0x73   : > { %334 = vst [vmem:[#allocation1] ss:$2 sm:$0xff] %v332_v9 }
  0x7a   : > { %v335_v10 = vld.sshfl [vmem:[#allocation1] sm:$0xff pattern:$0x75316420]  ;;  %v336_v11 = vld.sshfl [vmem:[#allocation1 + $0x8] sm:$0xff pattern:$0x75316420] }
  0x7b   : > { %349 = vst [vmem:[#allocation1] ss:$2 sm:$0xff] %v315_v8  ;;  %v339_v12 = vsel %vm239_vm0, %v335_v10, 0.0  ;;  %v340_v13 = vsel %vm239_vm0, %v336_v11, 0.0 }
  0x7c   : > { %v341_v14 = vadd.f32 %v340_v13, %v339_v12 }
  0x7e   : > { %342 = vadd.xlane.f32.xlu1 %v341_v14 }
  0x82   : > { %v350_v15 = vld.sshfl [vmem:[#allocation1] sm:$0xff pattern:$0x75316420]  ;;  %v351_v16 = vld.sshfl [vmem:[#allocation1 + $0x8] sm:$0xff pattern:$0x75316420] }
  0x83   : > { %v354_v17 = vsel %vm239_vm0, %v350_v15, 0.0  ;;  %v355_v18 = vsel %vm239_vm0, %v351_v16, 0.0 }
  0x84   : > { %v356_v19 = vadd.f32 %v355_v18, %v354_v17 }
  0x86   : > { %357 = vadd.xlane.f32.xlu0 %v356_v19 }
  0x8e   : > { %365 = vadd.xlane.f32.xlu0 %v364_v22 }
  0xf1   : > { %v343_v24 = vpop.xlane.xlu1 %342 }
  0xf2   : > { %v344_v25 = vadd.f32 %v343_v24, %v326_v23 }
  0xf4   : > { %346 = vst.msk [vmem:[#allocation2] sm:$0xf] %vm227_vm11, %v344_v25 }
  0xf9   : > { %v358_v27 = vpop.xlane.xlu0 %357 }
  0xfa   : > { %v359_v28 = vadd.f32 %v358_v27, %v347_v26 }
  0xfb   : > { %v372_v34 = vld [vmem:[#allocation2] sm:$0xf] }
  0xfc   : > { %360 = vst.msk [vmem:[#allocation3] sm:$0xf] %vm227_vm11, %v359_v28 }
  0xfd   : > { %373 = vst.msk [vmem:[%s222_s5] sm:$0xf] %vm227_vm11, %v372_v34 }
 0x101   : > { %v366_v30 = vpop.xlane.xlu0 %365 }
 0x102   : > { %v367_v31 = vadd.f32 %v366_v30, %v361_v29 }
 0x103   : > { %v374_v32 = vld [vmem:[#allocation3] sm:$0xf] }
 0x104   : > { %376 = vrot.lane.b32.xlu1 %v374_v32, %s693_s20  ;;  %368 = vst.msk [vmem:[#allocation4] sm:$0xf] %vm227_vm11, %v367_v31 }
 0x10b   : > { %v381_v33 = vld [vmem:[#allocation4] sm:$0xf] }
 0x10c   : > { %383 = vrot.lane.b32.xlu2 %v381_v33, %s694_s22 }
 0x166   : > { %v384_v35 = vpop.permute.xlu2 %383 }
 0x176   : > { %v377_v36 = vpop.permute.xlu1 %376 }
 0x177   : > { %380 = vst.msk [vmem:[%s222_s5] sm:$0xf] %vm379_vm12, %v377_v36 }
 0x178   : > { %387 = vst.msk [vmem:[%s222_s5] sm:$0xf] %vm386_vm13, %v384_v35 }
 0x179 PF: > { %s18_s14 = sadd.s32 1, %s690_s14   ;;  %s863_s9 = smov %s674_s10 }
 0x17a   : > { %p15_p0 = scmp.ge.s32.totalorder %s18_s14, 4   ;;  %s864_s10 = smov %s678_s11 }
 0x17b   : > { %s865_s11 = smov %s759_s21  ;;  %s866_s12 = smov %s686_s13 }
 0x17c   : > { %s867_s13 = smov %s869_s16  ;;  %17 = sbr.rel (!%p15_p0) target bundleno = 6 (0x6), region = 89 }
 0x181   :  { %407 = vsyncpa [#allocation6], 1 }
 0x182   :  { %409 = vsyncpa [#allocation6 + $0x1], 1 }
 0x183   :  { %410 = vsyncpa [#allocation8], 1 }
 0x184   :  { %412 = vsyncpa [#allocation8 + $0x1], 1 }

</bundles_post_ra>
